<compile_context>
chip_gen: v7x
topology: tpu7x:2x2x1
jax: 0.10.0
libtpu: 0.0.40
codegen_flags: <defaults>
</compile_context>

<pallas_src>
import math

import jax
import jax.numpy as jnp
from jax.experimental import pallas as pl
from jax.experimental.pallas import tpu as pltpu

_EPS = 1e-5  # PyTorch GroupNorm default eps


def _erf(x):
    # Abramowitz & Stegun 7.1.26 rational approximation (|err| < 1.5e-7),
    # built only from ops that lower cleanly on the TPU VPU/EUP.
    a1, a2, a3, a4, a5 = (0.254829592, -0.284496736, 1.421413741,
                          -1.453152027, 1.061405429)
    p = 0.3275911
    sign = jnp.where(x >= 0.0, 1.0, -1.0)
    ax = jnp.abs(x)
    t = 1.0 / (1.0 + p * ax)
    poly = t * (a1 + t * (a2 + t * (a3 + t * (a4 + t * a5))))
    return sign * (1.0 - poly * jnp.exp(-ax * ax))


def _gelu_exact(x):
    return x * 0.5 * (1.0 + _erf(x * (1.0 / math.sqrt(2.0))))


def _banded_conv_weights(w_oihw, w_spatial):
    """OIHW 3x3 conv weight -> banded/Toeplitz form (3, (W+2)*Cin, W*Cout).

    band[ky, (w+kx)*Cin + ci, w*Cout + co] = w_oihw[co, ci, ky, kx]
    so that, with xpad the zero-padded NHWC sample flattened to (H+2, (W+2)*Cin),
        conv_out[h, w*Cout + co] = sum_ky (xpad[ky:ky+H, :] @ band[ky])[h, w*Cout+co]
    which is exactly Conv2d(kernel=3, padding=1, bias=False).
    """
    c_out, c_in = int(w_oihw.shape[0]), int(w_oihw.shape[1])
    wp = w_spatial + 2
    wt = jnp.transpose(w_oihw, (2, 3, 1, 0)).astype(jnp.float32)  # (3,3,Cin,Cout)
    band = jnp.zeros((3, wp * c_in, w_spatial * c_out), jnp.float32)
    for kx in range(3):
        for w in range(w_spatial):
            band = band.at[:, (w + kx) * c_in:(w + kx + 1) * c_in,
                              w * c_out:(w + 1) * c_out].set(wt[:, kx])
    return band


def double_convolution(x_nchw, w1, w2, gamma, beta):
    """x_nchw: (B, Cin, H, W); w1: (Cout, Cin, 3, 3); w2: (Cout, Cout, 3, 3);
    gamma, beta: (Cout,). Returns (B, Cout, H, W) float32 (NCHW)."""
    B, Cin, H, W = x_nchw.shape
    Cout = w1.shape[0]
    Hp, Wp = H + 2, W + 2
    WCin, WCout = W * Cin, W * Cout
    inv_n = 1.0 / float(H * W * Cout)  # GroupNorm(1) normalizes over C*H*W

    def kernel(x_ref, w1_ref, w2_ref, g_ref, b_ref, o_ref, xpad_ref, mid_ref):
        # Zero ONLY the 1-pixel halo of the two padded scratch planes (4 thin
        # strips each, not the whole plane).  Done every grid step rather than
        # once under program_id==0 so it remains correct when the "parallel"
        # batch axis is sharded across TensorCores (each core has its own
        # scratch and may never execute step 0).
        xpad_ref[0:1, :] = jnp.zeros((1, Wp * Cin), jnp.float32)
        xpad_ref[Hp - 1:Hp, :] = jnp.zeros((1, Wp * Cin), jnp.float32)
        xpad_ref[:, 0:Cin] = jnp.zeros((Hp, Cin), jnp.float32)
        xpad_ref[:, (W + 1) * Cin:Wp * Cin] = jnp.zeros((Hp, Cin), jnp.float32)
        mid_ref[0:1, :] = jnp.zeros((1, Wp * Cout), jnp.float32)
        mid_ref[Hp - 1:Hp, :] = jnp.zeros((1, Wp * Cout), jnp.float32)
        mid_ref[:, 0:Cout] = jnp.zeros((Hp, Cout), jnp.float32)
        mid_ref[:, (W + 1) * Cout:Wp * Cout] = jnp.zeros((Hp, Cout), jnp.float32)

        # In-kernel zero padding of the input (no host-side jnp.pad, no extra
        # HBM round trip).  x_ref is the NHWC sample flattened to (H, W*Cin).
        xpad_ref[1:1 + H, Cin:Cin + WCin] = x_ref[...]

        def conv3x3(src_ref, wb_ref):
            # 3 MXU matmuls against the banded weights produce the conv output
            # directly in lane-dense (H, W*Cout) layout; only contiguous
            # leading-axis slices of the padded scratch are read (no strided
            # per-tap slicing, no in-kernel value reshapes).
            acc = jnp.dot(src_ref[0:H, :], wb_ref[0],
                          preferred_element_type=jnp.float32)
            for ky in (1, 2):
                acc = acc + jnp.dot(src_ref[ky:ky + H, :], wb_ref[ky],
                                    preferred_element_type=jnp.float32)
            return acc

        def group_norm(y):
            # GroupNorm(num_groups=1): one-pass stats (sum / sum-of-squares,
            # biased variance like PyTorch) + folded per-channel affine so the
            # per-element normalization is a single mul + add.
            s = jnp.sum(y)
            ss = jnp.sum(y * y)
            mean = s * inv_n
            var = ss * inv_n - mean * mean
            inv = jax.lax.rsqrt(var + _EPS)
            scale = g_ref[...] * inv             # (1, W*Cout): gamma tiled over W
            shift = b_ref[...] - mean * scale    # (1, W*Cout): beta  tiled over W
            return y * scale + shift

        # conv1 -> GroupNorm -> exact-erf GELU, all in lane-dense (H, W*Cout) f32
        h = _gelu_exact(group_norm(conv3x3(xpad_ref, w1_ref)))

        # intermediate into the interior of its padded scratch (padding=1)
        mid_ref[1:1 + H, Cout:Cout + WCout] = h

        # conv2 -> GroupNorm (same affine params, as in the PyTorch module)
        o_ref[...] = group_norm(conv3x3(mid_ref, w2_ref)).astype(o_ref.dtype)

    # ---- wrapper glue (plain JAX): layout only, no compute ----
    x2 = jnp.transpose(x_nchw, (0, 2, 3, 1)).astype(jnp.float32).reshape(B, H, WCin)
    wb1 = _banded_conv_weights(w1, W)                    # (3, Wp*Cin,  W*Cout)
    wb2 = _banded_conv_weights(w2, W)                    # (3, Wp*Cout, W*Cout)
    g_t = jnp.tile(gamma.astype(jnp.float32), W).reshape(1, WCout)
    b_t = jnp.tile(beta.astype(jnp.float32), W).reshape(1, WCout)

    out = pl.pallas_call(
        kernel,
        out_shape=jax.ShapeDtypeStruct((B, H, WCout), jnp.float32),
        grid_spec=pltpu.PrefetchScalarGridSpec(
            num_scalar_prefetch=0,
            grid=(B,),  # one sample per grid step; samples are independent
            in_specs=[
                pl.BlockSpec((None, H, WCin), lambda b: (b, 0, 0)),
                pl.BlockSpec((3, Wp * Cin, WCout), lambda b: (0, 0, 0)),
                pl.BlockSpec((3, Wp * Cout, WCout), lambda b: (0, 0, 0)),
                pl.BlockSpec((1, WCout), lambda b: (0, 0)),
                pl.BlockSpec((1, WCout), lambda b: (0, 0)),
            ],
            out_specs=pl.BlockSpec((None, H, WCout), lambda b: (b, 0, 0)),
            scratch_shapes=[
                pltpu.VMEM((Hp, Wp * Cin), jnp.float32),   # padded input plane
                pltpu.VMEM((Hp, Wp * Cout), jnp.float32),  # padded intermediate
            ],
        ),
        compiler_params=pltpu.CompilerParams(
            # Batch elements are independent -> allow Mosaic to shard the grid
            # across TensorCores (2 TCs on v7x); harmless on 1-TC v5e/v6e.
            dimension_semantics=("parallel",)),
    )(x2, wb1, wb2, g_t, b_t)

    # lane-dense (B, H, W*Cout) -> (B, Cout, H, W)
    return jnp.transpose(out.reshape(B, H, W, Cout), (0, 3, 1, 2))


def _reference(x, w1, w2, gamma, beta):
    # pure-JAX reference mirroring the PyTorch forward
    def conv(h, w):
        return jax.lax.conv_general_dilated(
            h, w, window_strides=(1, 1), padding=((1, 1), (1, 1)),
            dimension_numbers=("NCHW", "OIHW", "NCHW"))

    def gn(h):
        mean = h.mean(axis=(1, 2, 3), keepdims=True)
        var = ((h - mean) ** 2).mean(axis=(1, 2, 3), keepdims=True)
        hn = (h - mean) / jnp.sqrt(var + _EPS)
        return hn * gamma[None, :, None, None] + beta[None, :, None, None]

    h = gn(conv(x, w1))
    h = h * 0.5 * (1.0 + jax.scipy.special.erf(h / jnp.sqrt(2.0)))
    return gn(conv(h, w2))


if __name__ == "__main__":
    key = jax.random.PRNGKey(0)
    k1, k2, k3, k4, k5 = jax.random.split(key, 5)
    B, Cin, Cout, H, W = 2, 4, 8, 16, 16

    # deterministic synthetic params (Conv2d-style uniform init; GN affine)
    bound1 = 1.0 / math.sqrt(Cin * 9)
    bound2 = 1.0 / math.sqrt(Cout * 9)
    x = jax.random.normal(k1, (B, Cin, H, W), jnp.float32)
    w1 = jax.random.uniform(k2, (Cout, Cin, 3, 3), jnp.float32, -bound1, bound1)
    w2 = jax.random.uniform(k3, (Cout, Cout, 3, 3), jnp.float32, -bound2, bound2)
    gamma = 1.0 + 0.1 * jax.random.normal(k4, (Cout,), jnp.float32)
    beta = 0.1 * jax.random.normal(k5, (Cout,), jnp.float32)

    out = jax.block_until_ready(double_convolution(x, w1, w2, gamma, beta))

    ref = _reference(x, w1, w2, gamma, beta)
    assert out.shape == (B, Cout, H, W), out.shape
    max_err = float(jnp.max(jnp.abs(out - ref)))
    assert max_err < 1e-3, f"max abs error {max_err}"
    print("KERNEL_OK")
</pallas_src>

<mosaic_0001>
module attributes {stable_mosaic.version = 11 : i64} {
  func.func @kernel(%arg0: i32, %arg1: memref<1x16x64xf32, #tpu.memory_space<vmem>>, %arg2: memref<3x72x128xf32, #tpu.memory_space<vmem>>, %arg3: memref<3x144x128xf32, #tpu.memory_space<vmem>>, %arg4: memref<1x128xf32, #tpu.memory_space<vmem>>, %arg5: memref<1x128xf32, #tpu.memory_space<vmem>>, %arg6: memref<1x16x128xf32, #tpu.memory_space<vmem>>, %arg7: memref<18x72xf32, #tpu.memory_space<vmem>>, %arg8: memref<18x144xf32, #tpu.memory_space<vmem>>) attributes {dimension_semantics = [#tpu.dimension_semantics<parallel>], iteration_bounds = array<i64: 2>, scalar_prefetch = 0 : i64, scratch_operands = 2 : i64, tpu.core_type = #tpu.core_type<tc>, window_params = [{transform_indices = @transform_0, window_bounds = array<i64: 1, 16, 64>}, {pipeline_mode = #tpu.pipeline_mode<synchronous>, transform_indices = @transform_1, window_bounds = array<i64: 3, 72, 128>}, {pipeline_mode = #tpu.pipeline_mode<synchronous>, transform_indices = @transform_2, window_bounds = array<i64: 3, 144, 128>}, {pipeline_mode = #tpu.pipeline_mode<synchronous>, transform_indices = @transform_3, window_bounds = array<i64: 1, 128>}, {pipeline_mode = #tpu.pipeline_mode<synchronous>, transform_indices = @transform_4, window_bounds = array<i64: 1, 128>}, {transform_indices = @transform_5, window_bounds = array<i64: 1, 16, 128>}]} {
    %cst = arith.constant 0.000000e+00 : f32
    %0 = vector.broadcast %cst : f32 to vector<1x72xf32>
    %c0 = arith.constant 0 : index
    %c0_0 = arith.constant 0 : index
    %1 = vector.load %arg7[%c0, %c0_0] : memref<18x72xf32, #tpu.memory_space<vmem>>, vector<1x72xf32>
    tpu.vector_store %arg7[%c0, %c0_0], %0 {strides = array<i32>} : memref<18x72xf32, #tpu.memory_space<vmem>>, vector<1x72xf32>,
    %cst_1 = arith.constant 0.000000e+00 : f32
    %2 = vector.broadcast %cst_1 : f32 to vector<1x72xf32>
    %c17 = arith.constant 17 : index
    %c0_2 = arith.constant 0 : index
    %3 = vector.load %arg7[%c17, %c0_2] : memref<18x72xf32, #tpu.memory_space<vmem>>, vector<1x72xf32>
    tpu.vector_store %arg7[%c17, %c0_2], %2 {strides = array<i32>} : memref<18x72xf32, #tpu.memory_space<vmem>>, vector<1x72xf32>,
    %cst_3 = arith.constant 0.000000e+00 : f32
    %4 = vector.broadcast %cst_3 : f32 to vector<18x4xf32>
    %c0_4 = arith.constant 0 : index
    %c0_5 = arith.constant 0 : index
    %5 = vector.load %arg7[%c0_4, %c0_5] : memref<18x72xf32, #tpu.memory_space<vmem>>, vector<18x4xf32>
    tpu.vector_store %arg7[%c0_4, %c0_5], %4 {strides = array<i32>} : memref<18x72xf32, #tpu.memory_space<vmem>>, vector<18x4xf32>,
    %cst_6 = arith.constant 0.000000e+00 : f32
    %6 = vector.broadcast %cst_6 : f32 to vector<18x4xf32>
    %c0_7 = arith.constant 0 : index
    %c68 = arith.constant 68 : index
    %7 = vector.load %arg7[%c0_7, %c68] : memref<18x72xf32, #tpu.memory_space<vmem>>, vector<18x4xf32>
    tpu.vector_store %arg7[%c0_7, %c68], %6 {strides = array<i32>} : memref<18x72xf32, #tpu.memory_space<vmem>>, vector<18x4xf32>,
    %cst_8 = arith.constant 0.000000e+00 : f32
    %8 = vector.broadcast %cst_8 : f32 to vector<1x144xf32>
    %c0_9 = arith.constant 0 : index
    %c0_10 = arith.constant 0 : index
    %9 = vector.load %arg8[%c0_9, %c0_10] : memref<18x144xf32, #tpu.memory_space<vmem>>, vector<1x144xf32>
    tpu.vector_store %arg8[%c0_9, %c0_10], %8 {strides = array<i32>} : memref<18x144xf32, #tpu.memory_space<vmem>>, vector<1x144xf32>,
    %cst_11 = arith.constant 0.000000e+00 : f32
    %10 = vector.broadcast %cst_11 : f32 to vector<1x144xf32>
    %c17_12 = arith.constant 17 : index
    %c0_13 = arith.constant 0 : index
    %11 = vector.load %arg8[%c17_12, %c0_13] : memref<18x144xf32, #tpu.memory_space<vmem>>, vector<1x144xf32>
    tpu.vector_store %arg8[%c17_12, %c0_13], %10 {strides = array<i32>} : memref<18x144xf32, #tpu.memory_space<vmem>>, vector<1x144xf32>,
    %cst_14 = arith.constant 0.000000e+00 : f32
    %12 = vector.broadcast %cst_14 : f32 to vector<18x8xf32>
    %c0_15 = arith.constant 0 : index
    %c0_16 = arith.constant 0 : index
    %13 = vector.load %arg8[%c0_15, %c0_16] : memref<18x144xf32, #tpu.memory_space<vmem>>, vector<18x8xf32>
    tpu.vector_store %arg8[%c0_15, %c0_16], %12 {strides = array<i32>} : memref<18x144xf32, #tpu.memory_space<vmem>>, vector<18x8xf32>,
    %cst_17 = arith.constant 0.000000e+00 : f32
    %14 = vector.broadcast %cst_17 : f32 to vector<18x8xf32>
    %c0_18 = arith.constant 0 : index
    %c136 = arith.constant 136 : index
    %15 = vector.load %arg8[%c0_18, %c136] : memref<18x144xf32, #tpu.memory_space<vmem>>, vector<18x8xf32>
    tpu.vector_store %arg8[%c0_18, %c136], %14 {strides = array<i32>} : memref<18x144xf32, #tpu.memory_space<vmem>>, vector<18x8xf32>,
    %c0_19 = arith.constant 0 : index
    %c0_20 = arith.constant 0 : index
    %c0_21 = arith.constant 0 : index
    %16 = vector.load %arg1[%c0_19, %c0_20, %c0_21] : memref<1x16x64xf32, #tpu.memory_space<vmem>>, vector<1x16x64xf32>
    %17 = vector.shape_cast %16 : vector<1x16x64xf32> to vector<16x64xf32>
    %c1 = arith.constant 1 : index
    %c4 = arith.constant 4 : index
    %18 = vector.load %arg7[%c1, %c4] : memref<18x72xf32, #tpu.memory_space<vmem>>, vector<16x64xf32>
    tpu.vector_store %arg7[%c1, %c4], %17 {strides = array<i32>} : memref<18x72xf32, #tpu.memory_space<vmem>>, vector<16x64xf32>,
    %c0_22 = arith.constant 0 : index
    %c0_23 = arith.constant 0 : index
    %19 = vector.load %arg7[%c0_22, %c0_23] : memref<18x72xf32, #tpu.memory_space<vmem>>, vector<16x72xf32>
    %c0_24 = arith.constant 0 : index
    %c0_25 = arith.constant 0 : index
    %c0_26 = arith.constant 0 : index
    %20 = vector.load %arg2[%c0_24, %c0_25, %c0_26] : memref<3x72x128xf32, #tpu.memory_space<vmem>>, vector<1x72x128xf32>
    %21 = vector.shape_cast %20 : vector<1x72x128xf32> to vector<72x128xf32>
    %cst_27 = arith.constant dense<0.000000e+00> : vector<16x128xf32>
    %22 = tpu.matmul %19, %21, %cst_27 {dimension_numbers = #tpu.dot_dimension_numbers<[1], [0], [0], [1], [0, 0, 1, 1], [], []>} : vector<16x72xf32>, vector<72x128xf32>, vector<16x128xf32> -> vector<16x128xf32>
    %c1_28 = arith.constant 1 : index
    %c0_29 = arith.constant 0 : index
    %23 = vector.load %arg7[%c1_28, %c0_29] : memref<18x72xf32, #tpu.memory_space<vmem>>, vector<16x72xf32>
    %c1_30 = arith.constant 1 : index
    %c0_31 = arith.constant 0 : index
    %c0_32 = arith.constant 0 : index
    %24 = vector.load %arg2[%c1_30, %c0_31, %c0_32] : memref<3x72x128xf32, #tpu.memory_space<vmem>>, vector<1x72x128xf32>
    %25 = vector.shape_cast %24 : vector<1x72x128xf32> to vector<72x128xf32>
    %cst_33 = arith.constant dense<0.000000e+00> : vector<16x128xf32>
    %26 = tpu.matmul %23, %25, %cst_33 {dimension_numbers = #tpu.dot_dimension_numbers<[1], [0], [0], [1], [0, 0, 1, 1], [], []>} : vector<16x72xf32>, vector<72x128xf32>, vector<16x128xf32> -> vector<16x128xf32>
    %27 = arith.addf %22, %26 : vector<16x128xf32>
    %c2 = arith.constant 2 : index
    %c0_34 = arith.constant 0 : index
    %28 = vector.load %arg7[%c2, %c0_34] : memref<18x72xf32, #tpu.memory_space<vmem>>, vector<16x72xf32>
    %c2_35 = arith.constant 2 : index
    %c0_36 = arith.constant 0 : index
    %c0_37 = arith.constant 0 : index
    %29 = vector.load %arg2[%c2_35, %c0_36, %c0_37] : memref<3x72x128xf32, #tpu.memory_space<vmem>>, vector<1x72x128xf32>
    %30 = vector.shape_cast %29 : vector<1x72x128xf32> to vector<72x128xf32>
    %cst_38 = arith.constant dense<0.000000e+00> : vector<16x128xf32>
    %31 = tpu.matmul %28, %30, %cst_38 {dimension_numbers = #tpu.dot_dimension_numbers<[1], [0], [0], [1], [0, 0, 1, 1], [], []>} : vector<16x72xf32>, vector<72x128xf32>, vector<16x128xf32> -> vector<16x128xf32>
    %32 = arith.addf %27, %31 : vector<16x128xf32>
    %33 = vector.shape_cast %32 : vector<16x128xf32> to vector<1x16x128xf32>
    %cst_39 = arith.constant dense<0.000000e+00> : vector<1xf32>
    %34 = vector.multi_reduction <add>, %33, %cst_39 [1, 2] : vector<1x16x128xf32> to vector<1xf32>
    %35 = vector.shape_cast %34 : vector<1xf32> to vector<1x1x1xf32>
    %36 = vector.extract %35[0, 0, 0] : f32 from vector<1x1x1xf32>
    %37 = arith.mulf %32, %32 : vector<16x128xf32>
    %38 = vector.shape_cast %37 : vector<16x128xf32> to vector<1x16x128xf32>
    %cst_40 = arith.constant dense<0.000000e+00> : vector<1xf32>
    %39 = vector.multi_reduction <add>, %38, %cst_40 [1, 2] : vector<1x16x128xf32> to vector<1xf32>
    %40 = vector.shape_cast %39 : vector<1xf32> to vector<1x1x1xf32>
    %41 = vector.extract %40[0, 0, 0] : f32 from vector<1x1x1xf32>
    %cst_41 = arith.constant 4.8828125E-4 : f32
    %42 = arith.mulf %36, %cst_41 : f32
    %cst_42 = arith.constant 4.8828125E-4 : f32
    %43 = arith.mulf %41, %cst_42 : f32
    %44 = arith.mulf %42, %42 : f32
    %45 = arith.subf %43, %44 : f32
    %cst_43 = arith.constant 9.99999974E-6 : f32
    %46 = arith.addf %45, %cst_43 : f32
    %47 = math.rsqrt %46 : f32
    %c0_44 = arith.constant 0 : index
    %c0_45 = arith.constant 0 : index
    %48 = vector.load %arg4[%c0_44, %c0_45] : memref<1x128xf32, #tpu.memory_space<vmem>>, vector<1x128xf32>
    %49 = vector.broadcast %47 : f32 to vector<1x128xf32>
    %50 = arith.mulf %48, %49 : vector<1x128xf32>
    %c0_46 = arith.constant 0 : index
    %c0_47 = arith.constant 0 : index
    %51 = vector.load %arg5[%c0_46, %c0_47] : memref<1x128xf32, #tpu.memory_space<vmem>>, vector<1x128xf32>
    %52 = vector.broadcast %42 : f32 to vector<1x128xf32>
    %53 = arith.mulf %52, %50 : vector<1x128xf32>
    %54 = arith.subf %51, %53 : vector<1x128xf32>
    %55 = vector.broadcast %50 : vector<1x128xf32> to vector<16x128xf32>
    %56 = arith.mulf %32, %55 : vector<16x128xf32>
    %57 = vector.broadcast %54 : vector<1x128xf32> to vector<16x128xf32>
    %58 = arith.addf %56, %57 : vector<16x128xf32>
    %cst_48 = arith.constant 5.000000e-01 : f32
    %59 = vector.broadcast %cst_48 : f32 to vector<16x128xf32>
    %60 = arith.mulf %58, %59 : vector<16x128xf32>
    %cst_49 = arith.constant 0.707106769 : f32
    %61 = vector.broadcast %cst_49 : f32 to vector<16x128xf32>
    %62 = arith.mulf %58, %61 : vector<16x128xf32>
    %cst_50 = arith.constant 0.000000e+00 : f32
    %63 = vector.broadcast %cst_50 : f32 to vector<16x128xf32>
    %64 = arith.cmpf oge, %62, %63 : vector<16x128xf32>
    %cst_51 = arith.constant 1.000000e+00 : f32
    %cst_52 = arith.constant -1.000000e+00 : f32
    %65 = vector.broadcast %cst_51 : f32 to vector<16x128xf32>
    %66 = vector.broadcast %cst_52 : f32 to vector<16x128xf32>
    %67 = arith.select %64, %65, %66 : vector<16x128xi1>, vector<16x128xf32>
    %68 = math.absf %62 : vector<16x128xf32>
    %cst_53 = arith.constant 0.327591091 : f32
    %69 = vector.broadcast %cst_53 : f32 to vector<16x128xf32>
    %70 = arith.mulf %69, %68 : vector<16x128xf32>
    %cst_54 = arith.constant 1.000000e+00 : f32
    %71 = vector.broadcast %cst_54 : f32 to vector<16x128xf32>
    %72 = arith.addf %71, %70 : vector<16x128xf32>
    %cst_55 = arith.constant 1.000000e+00 : f32
    %73 = vector.broadcast %cst_55 : f32 to vector<16x128xf32>
    %74 = arith.divf %73, %72 : vector<16x128xf32>
    %cst_56 = arith.constant 1.06140542 : f32
    %75 = vector.broadcast %cst_56 : f32 to vector<16x128xf32>
    %76 = arith.mulf %74, %75 : vector<16x128xf32>
    %cst_57 = arith.constant -1.45315206 : f32
    %77 = vector.broadcast %cst_57 : f32 to vector<16x128xf32>
    %78 = arith.addf %77, %76 : vector<16x128xf32>
    %79 = arith.mulf %74, %78 : vector<16x128xf32>
    %cst_58 = arith.constant 1.42141378 : f32
    %80 = vector.broadcast %cst_58 : f32 to vector<16x128xf32>
    %81 = arith.addf %80, %79 : vector<16x128xf32>
    %82 = arith.mulf %74, %81 : vector<16x128xf32>
    %cst_59 = arith.constant -0.284496725 : f32
    %83 = vector.broadcast %cst_59 : f32 to vector<16x128xf32>
    %84 = arith.addf %83, %82 : vector<16x128xf32>
    %85 = arith.mulf %74, %84 : vector<16x128xf32>
    %cst_60 = arith.constant 0.254829586 : f32
    %86 = vector.broadcast %cst_60 : f32 to vector<16x128xf32>
    %87 = arith.addf %86, %85 : vector<16x128xf32>
    %88 = arith.mulf %74, %87 : vector<16x128xf32>
    %cst_61 = arith.constant 0.000000e+00 : f32
    %89 = vector.broadcast %cst_61 : f32 to vector<16x128xf32>
    %90 = arith.subf %89, %68 : vector<16x128xf32>
    %91 = arith.mulf %90, %68 : vector<16x128xf32>
    %92 = math.exp %91 : vector<16x128xf32>
    %93 = arith.mulf %88, %92 : vector<16x128xf32>
    %cst_62 = arith.constant 1.000000e+00 : f32
    %94 = vector.broadcast %cst_62 : f32 to vector<16x128xf32>
    %95 = arith.subf %94, %93 : vector<16x128xf32>
    %96 = arith.mulf %67, %95 : vector<16x128xf32>
    %cst_63 = arith.constant 1.000000e+00 : f32
    %97 = vector.broadcast %cst_63 : f32 to vector<16x128xf32>
    %98 = arith.addf %97, %96 : vector<16x128xf32>
    %99 = arith.mulf %60, %98 : vector<16x128xf32>
    %c1_64 = arith.constant 1 : index
    %c8 = arith.constant 8 : index
    %100 = vector.load %arg8[%c1_64, %c8] : memref<18x144xf32, #tpu.memory_space<vmem>>, vector<16x128xf32>
    tpu.vector_store %arg8[%c1_64, %c8], %99 {strides = array<i32>} : memref<18x144xf32, #tpu.memory_space<vmem>>, vector<16x128xf32>,
    %c0_65 = arith.constant 0 : index
    %c0_66 = arith.constant 0 : index
    %101 = vector.load %arg8[%c0_65, %c0_66] : memref<18x144xf32, #tpu.memory_space<vmem>>, vector<16x144xf32>
    %c0_67 = arith.constant 0 : index
    %c0_68 = arith.constant 0 : index
    %c0_69 = arith.constant 0 : index
    %102 = vector.load %arg3[%c0_67, %c0_68, %c0_69] : memref<3x144x128xf32, #tpu.memory_space<vmem>>, vector<1x144x128xf32>
    %103 = vector.shape_cast %102 : vector<1x144x128xf32> to vector<144x128xf32>
    %cst_70 = arith.constant dense<0.000000e+00> : vector<16x128xf32>
    %104 = tpu.matmul %101, %103, %cst_70 {dimension_numbers = #tpu.dot_dimension_numbers<[1], [0], [0], [1], [0, 0, 1, 1], [], []>} : vector<16x144xf32>, vector<144x128xf32>, vector<16x128xf32> -> vector<16x128xf32>
    %c1_71 = arith.constant 1 : index
    %c0_72 = arith.constant 0 : index
    %105 = vector.load %arg8[%c1_71, %c0_72] : memref<18x144xf32, #tpu.memory_space<vmem>>, vector<16x144xf32>
    %c1_73 = arith.constant 1 : index
    %c0_74 = arith.constant 0 : index
    %c0_75 = arith.constant 0 : index
    %106 = vector.load %arg3[%c1_73, %c0_74, %c0_75] : memref<3x144x128xf32, #tpu.memory_space<vmem>>, vector<1x144x128xf32>
    %107 = vector.shape_cast %106 : vector<1x144x128xf32> to vector<144x128xf32>
    %cst_76 = arith.constant dense<0.000000e+00> : vector<16x128xf32>
    %108 = tpu.matmul %105, %107, %cst_76 {dimension_numbers = #tpu.dot_dimension_numbers<[1], [0], [0], [1], [0, 0, 1, 1], [], []>} : vector<16x144xf32>, vector<144x128xf32>, vector<16x128xf32> -> vector<16x128xf32>
    %109 = arith.addf %104, %108 : vector<16x128xf32>
    %c2_77 = arith.constant 2 : index
    %c0_78 = arith.constant 0 : index
    %110 = vector.load %arg8[%c2_77, %c0_78] : memref<18x144xf32, #tpu.memory_space<vmem>>, vector<16x144xf32>
    %c2_79 = arith.constant 2 : index
    %c0_80 = arith.constant 0 : index
    %c0_81 = arith.constant 0 : index
    %111 = vector.load %arg3[%c2_79, %c0_80, %c0_81] : memref<3x144x128xf32, #tpu.memory_space<vmem>>, vector<1x144x128xf32>
    %112 = vector.shape_cast %111 : vector<1x144x128xf32> to vector<144x128xf32>
    %cst_82 = arith.constant dense<0.000000e+00> : vector<16x128xf32>
    %113 = tpu.matmul %110, %112, %cst_82 {dimension_numbers = #tpu.dot_dimension_numbers<[1], [0], [0], [1], [0, 0, 1, 1], [], []>} : vector<16x144xf32>, vector<144x128xf32>, vector<16x128xf32> -> vector<16x128xf32>
    %114 = arith.addf %109, %113 : vector<16x128xf32>
    %115 = vector.shape_cast %114 : vector<16x128xf32> to vector<1x16x128xf32>
    %cst_83 = arith.constant dense<0.000000e+00> : vector<1xf32>
    %116 = vector.multi_reduction <add>, %115, %cst_83 [1, 2] : vector<1x16x128xf32> to vector<1xf32>
    %117 = vector.shape_cast %116 : vector<1xf32> to vector<1x1x1xf32>
    %118 = vector.extract %117[0, 0, 0] : f32 from vector<1x1x1xf32>
    %119 = arith.mulf %114, %114 : vector<16x128xf32>
    %120 = vector.shape_cast %119 : vector<16x128xf32> to vector<1x16x128xf32>
    %cst_84 = arith.constant dense<0.000000e+00> : vector<1xf32>
    %121 = vector.multi_reduction <add>, %120, %cst_84 [1, 2] : vector<1x16x128xf32> to vector<1xf32>
    %122 = vector.shape_cast %121 : vector<1xf32> to vector<1x1x1xf32>
    %123 = vector.extract %122[0, 0, 0] : f32 from vector<1x1x1xf32>
    %cst_85 = arith.constant 4.8828125E-4 : f32
    %124 = arith.mulf %118, %cst_85 : f32
    %cst_86 = arith.constant 4.8828125E-4 : f32
    %125 = arith.mulf %123, %cst_86 : f32
    %126 = arith.mulf %124, %124 : f32
    %127 = arith.subf %125, %126 : f32
    %cst_87 = arith.constant 9.99999974E-6 : f32
    %128 = arith.addf %127, %cst_87 : f32
    %129 = math.rsqrt %128 : f32
    %c0_88 = arith.constant 0 : index
    %c0_89 = arith.constant 0 : index
    %130 = vector.load %arg4[%c0_88, %c0_89] : memref<1x128xf32, #tpu.memory_space<vmem>>, vector<1x128xf32>
    %131 = vector.broadcast %129 : f32 to vector<1x128xf32>
    %132 = arith.mulf %130, %131 : vector<1x128xf32>
    %c0_90 = arith.constant 0 : index
    %c0_91 = arith.constant 0 : index
    %133 = vector.load %arg5[%c0_90, %c0_91] : memref<1x128xf32, #tpu.memory_space<vmem>>, vector<1x128xf32>
    %134 = vector.broadcast %124 : f32 to vector<1x128xf32>
    %135 = arith.mulf %134, %132 : vector<1x128xf32>
    %136 = arith.subf %133, %135 : vector<1x128xf32>
    %137 = vector.broadcast %132 : vector<1x128xf32> to vector<16x128xf32>
    %138 = arith.mulf %114, %137 : vector<16x128xf32>
    %139 = vector.broadcast %136 : vector<1x128xf32> to vector<16x128xf32>
    %140 = arith.addf %138, %139 : vector<16x128xf32>
    %c0_92 = arith.constant 0 : index
    %c0_93 = arith.constant 0 : index
    %c0_94 = arith.constant 0 : index
    %141 = vector.load %arg6[%c0_92, %c0_93, %c0_94] : memref<1x16x128xf32, #tpu.memory_space<vmem>>, vector<1x16x128xf32>
    %142 = vector.shape_cast %141 : vector<1x16x128xf32> to vector<16x128xf32>
    %143 = vector.shape_cast %140 : vector<16x128xf32> to vector<1x16x128xf32>
    tpu.vector_store %arg6[%c0_92, %c0_93, %c0_94], %143 {strides = array<i32>} : memref<1x16x128xf32, #tpu.memory_space<vmem>>, vector<1x16x128xf32>,
    return
  }
  func.func @transform_0(%arg0: i32) -> (i32, i32, i32) {
    %c0_i32 = arith.constant 0 : i32
    %c0_i32_0 = arith.constant 0 : i32
    %c0_i32_1 = arith.constant 0 : i32
    return %arg0, %c0_i32, %c0_i32_0 : i32, i32, i32
  }
  func.func @transform_1(%arg0: i32) -> (i32, i32, i32) {
    %c0_i32 = arith.constant 0 : i32
    %c0_i32_0 = arith.constant 0 : i32
    %c0_i32_1 = arith.constant 0 : i32
    %c0_i32_2 = arith.constant 0 : i32
    return %c0_i32, %c0_i32_0, %c0_i32_1 : i32, i32, i32
  }
  func.func @transform_2(%arg0: i32) -> (i32, i32, i32) {
    %c0_i32 = arith.constant 0 : i32
    %c0_i32_0 = arith.constant 0 : i32
    %c0_i32_1 = arith.constant 0 : i32
    %c0_i32_2 = arith.constant 0 : i32
    return %c0_i32, %c0_i32_0, %c0_i32_1 : i32, i32, i32
  }
  func.func @transform_3(%arg0: i32) -> (i32, i32) {
    %c0_i32 = arith.constant 0 : i32
    %c0_i32_0 = arith.constant 0 : i32
    %c0_i32_1 = arith.constant 0 : i32
    return %c0_i32, %c0_i32_0 : i32, i32
  }
  func.func @transform_4(%arg0: i32) -> (i32, i32) {
    %c0_i32 = arith.constant 0 : i32
    %c0_i32_0 = arith.constant 0 : i32
    %c0_i32_1 = arith.constant 0 : i32
    return %c0_i32, %c0_i32_0 : i32, i32
  }
  func.func @transform_5(%arg0: i32) -> (i32, i32, i32) {
    %c0_i32 = arith.constant 0 : i32
    %c0_i32_0 = arith.constant 0 : i32
    %c0_i32_1 = arith.constant 0 : i32
    return %arg0, %c0_i32, %c0_i32_0 : i32, i32, i32
  }
}

</mosaic_0001>

<bundles_post_ra>
// kernel: tpu_custom_call.1
= control target key start
LH: loop header
LB: loop body
LE: loop exit
PB: predicated region body
PF: predicated region fallthrough
CT: control target
= control target key end

     0   :  { %10 = vsyncpa [#allocation5], 0  ;;  %s2186_s0 = inlined_call_operand.hbm [shape: f32[2,16,64], index: 0, kind: input, shape index: {}]   ;;  %s2187_s1 = inlined_call_operand.hbm [shape: f32[3,72,128], index: 1, kind: input, shape index: {}]   ;;  %s2188_s2 = inlined_call_operand.hbm [shape: f32[3,144,128], index: 2, kind: input, shape index: {}]   ;;  %s2189_s3 = inlined_call_operand.vmem [shape: f32[1,128], index: 3, kind: input, shape index: {}]   ;;  %s2190_s4 = inlined_call_operand.vmem [shape: f32[1,128], index: 4, kind: input, shape index: {}]   ;;  %s2191_s5 = inlined_call_operand.hbm [shape: f32[2,16,128], index: 5, kind: output, shape index: {}]  }
   0x1   :  { %12 = vsyncpa [#allocation5 + $0x1], 0 }
   0x2   :  { %13 = vsyncpa [#allocation8], 0 }
   0x3   :  { %14 = vsyncpa [#allocation6], 0 }
   0x4   :  { %16 = vsyncpa [#allocation6 + $0x1], 0  ;;  %s1803_s18 = smov 0   ;;  %s1805_s19 = smov 0  }
   0x5   :  { %s1807_s20 = smov 0   ;;  %s1809_s21 = smov 0  }
   0x6 LB: > { %s1824_s22 = sadd.s32 4294967295, %s1759_s21   ;;  %s1237_s23 = sadd.s32 4294967294, %s1759_s21   ;;  %s1759_s21 = sphi %s1809_s21, %s2211_s21   ;;  %s1755_s20 = sphi %s1807_s20, %s2210_s20   ;;  %s1751_s19 = sphi %s1805_s19, %s2209_s19   ;;  %s1747_s18 = sphi %s1803_s18, %s2208_s18  }
   0x7   : > { %p42_p0 = scmp.ne.s32.totalorder %s1751_s19, %s1747_s18  ;;  %p2192_p1 = scmp.eq.s32.totalorder %s1824_s22, 0 }
   0x8   : > { %p156_p3 = scmp.eq.s32.totalorder %s1237_s23, 1  ;;  %p1238_p5 = scmp.ge.s32.totalorder %s1759_s21, 1 }
   0x9   : > { %p1833_p4 = por %p2192_p1, %p42_p0  ;;  %p163_p7 = scmp.lt.s32.totalorder %s1759_s21, 3 }
   0xa   : > { %p1838_p6 = por %p156_p3, %p42_p0  ;;  %s1761_s27 = smov [#allocation7]  }
   0xb   : > { %s2195_s24 = scalar_select %p1833_p4, 1, 0 }
   0xc   : > { %s2196_s25 = scalar_select %p1838_p6, 1, 0 }
   0xd   : > { %p1843_p8 = pnand %p1238_p5, %p163_p7  ;;  %s175_s28 = sshll.u32 %s1761_s27, 4  ;;  %s1847_s28 = int_to_ptr.vmem [resolvable:$true] %s175_s28 }
   0xe   : > { %s1762_s30 = smov [#allocation9]   ;;  %s1603_s9 = scalar_lea.hbm %s2187_s1, 3456 }
   0xf   : > { %p1528_p9 = pneg %p1843_p8  ;;  %s188_s6 = sshll.u32 %s1762_s30, 4  ;;  %s1858_s6 = int_to_ptr.vmem [resolvable:$true] %s188_s6 }
  0x10   : > { %p1604_p12 = scmp.ne.s32.totalorder %s2187_s1, %s1603_s9  ;;  %p1610_p5 = scmp.lt.u32.totalorder %s1603_s9, %s2187_s1 }
  0x11   : > { %p1854_p11 = pnand %p1528_p9, %p2192_p1 }
  0x13   : > { %p1605_p13 = pneg %p1854_p11 }
  0x15   : > { %p1606_p0 = pnand %p1605_p13, %p1604_p12 }
  0x17   : > { %p1607_p3 = pneg %p1606_p0 }
  0x19   : > { %p1612_p7 = pnand %p1610_p5, %p1607_p3 }
  0x1b   : > { %1615 = shalt.err (!%p1612_p7)
}
  0x1c   : > { %s1616_s14 = scalar_lea.vmem %s1847_s28, 3456  ;;  %p1624_p2 = scmp.lt.s32.totalorder %s1847_s28, %s1847_s28 }
  0x1d   : > { %p1617_p9 = scmp.ne.s32.totalorder %s1847_s28, %s1616_s14  ;;  %p1625_p12 = scmp.lt.s32.totalorder %s1616_s14, %s1616_s14 }
  0x1f   : > { %p1619_p10 = pnand %p1617_p9, %p1605_p13  ;;  %p1626_p0 = por %p1625_p12, %p1624_p2 }
  0x21   : > { %p1620_p1 = pneg %p1619_p10 }
  0x23   : > { %p1627_p6 = pnand %p1626_p0, %p1620_p1 }
  0x25   : > { %1630 = shalt.err (!%p1627_p6)
}
  0x26   : > { %s1763_s15 = smov 128   ;;  %s1764_s16 = smov 8  }
  0x27   : > { %1531 = dma.hbm_to_vmem [thread:$0]  (!%p1854_p11), %s2187_s1, 3456, %s1847_s28, [#allocation8], %s1763_s15, %s1763_s15, %s1764_s16  }
  0x28   : > { %s1631_s7 = scalar_lea.hbm %s2188_s2, 6912 }
  0x29   : > { %p1632_p1 = scmp.ne.s32.totalorder %s2188_s2, %s1631_s7  ;;  %p1638_p10 = scmp.lt.u32.totalorder %s1631_s7, %s2188_s2 }
  0x2b   : > { %p1634_p2 = pnand %p1632_p1, %p1605_p13 }
  0x2d   : > { %p1635_p6 = pneg %p1634_p2 }
  0x2f   : > { %p1640_p3 = pnand %p1638_p10, %p1635_p6 }
  0x31   : > { %1643 = shalt.err (!%p1640_p3)
}
  0x32   : > { %s1644_s28 = scalar_lea.vmem %s1858_s6, 6912  ;;  %p1652_p12 = scmp.lt.s32.totalorder %s1858_s6, %s1858_s6 }
  0x33   : > { %p1645_p5 = scmp.ne.s32.totalorder %s1858_s6, %s1644_s28  ;;  %p1653_p0 = scmp.lt.s32.totalorder %s1644_s28, %s1644_s28 }
  0x35   : > { %p1647_p7 = pnand %p1645_p5, %p1605_p13  ;;  %p1654_p1 = por %p1653_p0, %p1652_p12 }
  0x37   : > { %p1648_p9 = pneg %p1647_p7 }
  0x39   : > { %p1655_p2 = pnand %p1654_p1, %p1648_p9 }
  0x3b   : > { %1658 = shalt.err (!%p1655_p2)
}
  0x3c   : > { %1534 = dma.hbm_to_vmem [thread:$0]  (!%p1854_p11), %s2188_s2, 6912, %s1858_s6, [#allocation8], %s1763_s15, %s1763_s15, %s1764_s16  }
  0x3d   : > { %s1919_s29 = sadd.s32 1, %s1759_s21   ;;  %s29_s14 = sadd.s32 1, %s1755_s20 }
  0x3e   : > { %s26_s17 = ssub.s32 %s1759_s21, %s1919_s29  ;;  %p36_p13 = scmp.ne.s32.totalorder %s1755_s20, %s1751_s19 }
  0x3f   : > { %p27_p6 = scmp.eq.s32.totalorder %s26_s17, 0  ;;  %p37_p10 = scmp.eq.s32.totalorder %s1759_s21, 0 }
  0x40   : > { %p2199_p3 = scmp.eq.s32.totalorder %s1824_s22, 1  ;;  %p1545_p7 = scmp.lt.s32.totalorder %s1759_s21, 2 }
  0x41   : > { %s1935_s27 = scalar_select %p27_p6, %s1755_s20, %s29_s14  }
  0x42   : > { %p1929_p5 = por %p2199_p3, %p36_p13  ;;  %p38_p9 = por %p37_p10, %p36_p13 }
  0x43   : > { %s208_s30 = sand.u32 1, %s1755_s20   ;;  %s1267_s6 = sshll.u32 %s1759_s21, 8 }
  0x44   : > { %s2200_s23 = scalar_select %p1929_p5, 1, 0 }
  0x45   : > { %s1242_s7 = sshll.u32 %s208_s30, 4  ;;  %s1942_s10 = scalar_lea.hbm %s2186_s0, %s1267_s6 }
  0x46   : > { %s212_s11 = scalar_lea.vmem [#allocation4], %s1242_s7  ;;  %p1946_p11 = pnand %p1545_p7, %p38_p9 }
  0x47   : > { %s219_s28 = sshll.u32 %s212_s11, 4  ;;  %s1950_s13 = scalar_lea.sflag [#allocation5], %s208_s30  ;;  %s1944_s28 = int_to_ptr.vmem [resolvable:$true] %s219_s28 }
  0x48   : > { %s1659_s14 = scalar_lea.hbm %s1942_s10, 256  ;;  %p1661_p0 = pneg %p1946_p11 }
  0x49   : > { %p1660_p12 = scmp.ne.s32.totalorder %s1942_s10, %s1659_s14  ;;  %s1664_s6 = scalar_lea.hbm %s2186_s0, 512 }
  0x4a   : > { %p1665_p13 = scmp.lt.u32.totalorder %s1942_s10, %s2186_s0  ;;  %p1666_p6 = scmp.lt.u32.totalorder %s1664_s6, %s1659_s14 }
  0x4b   : > { %p1662_p1 = pnand %p1661_p0, %p1660_p12  ;;  %p1668_p3 = scmp.lt.u32.totalorder %s1659_s14, %s1942_s10 }
  0x4c   : > { %p1667_p10 = por %p1666_p6, %p1665_p13 }
  0x4d   : > { %p1663_p2 = pneg %p1662_p1 }
  0x4e   : > { %p1669_p7 = por %p1668_p3, %p1667_p10 }
  0x50   : > { %p1670_p9 = pnand %p1669_p7, %p1663_p2 }
  0x52   : > { %1673 = shalt.err (!%p1670_p9)
}
  0x53   : > { %s1674_s30 = scalar_lea.vmem %s1944_s28, 256  ;;  %s1765_s11 = smov [#allocation4]  }
  0x54   : > { %p1675_p12 = scmp.ne.s32.totalorder %s1944_s28, %s1674_s30  ;;  %s1679_s17 = sshll.u32 %s1765_s11, 4  ;;  %s1680_s17 = int_to_ptr.vmem [resolvable:$false] %s1679_s17 }
  0x55   : > { %s1681_s7 = scalar_lea.vmem %s1680_s17, 512  ;;  %p1682_p4 = scmp.lt.s32.totalorder %s1944_s28, %s1680_s17 }
  0x56   : > { %p1677_p1 = pnand %p1675_p12, %p1661_p0  ;;  %p1683_p13 = scmp.lt.s32.totalorder %s1681_s7, %s1674_s30 }
  0x58   : > { %p1678_p5 = pneg %p1677_p1  ;;  %p1684_p6 = por %p1683_p13, %p1682_p4 }
  0x5a   : > { %p1685_p10 = pnand %p1684_p6, %p1678_p5 }
  0x5c   : > { %1688 = shalt.err (!%p1685_p10)
}
  0x5d   : > { %1538 = dma.hbm_to_vmem [thread:$0]  (!%p1946_p11), %s1942_s10, 256, %s1944_s28, %s1950_s13, %s1763_s15, %s1763_s15, %s1764_s16  }
  0x5e   : > { %231 = sbr.rel (%p1843_p8) target bundleno = 1504 (0x5e0), region = 40  ;;  %s1984_s14 = sand.u32 (!%p1843_p8), 1, %s1751_s19  }
  0x5f   : > { %s1246_s6 = sshll.u32 (!%p1843_p8), %s1984_s14, 4  ;;  %s234_s8 = scalar_lea.sflag (!%p1843_p8), [#allocation5], %s1984_s14 }
  0x60   : > { %s237_s12 = scalar_lea.vmem (!%p1843_p8), [#allocation4], %s1246_s6  ;;  %p2202_p4 = scmp.ne.s32.totalorder (!%p1843_p8), %s2195_s24, 0 }
  0x65   : > { %1734 = dma.done.wait (%p2202_p4), %s234_s8, 256  }
  0x66   : > { %1736 = vsyncadd (%p2202_p4), %s234_s8, 4294967040  ;;  %p2203_p5 = scmp.eq.s32.totalorder %s1824_s22, 0 }
  0x68   : > { %1738 = dma.done.wait (%p2203_p5), [#allocation8], 10368   ;;  %p2204_p8 = pmov %p2203_p5 }
  0x69   : > { %vm272_vm0 = vcmask 581632   ;;  %vm275_vm1 = vcmask 31744   ;;  %vm280_vm2 = vcmask 589344   ;;  %v1766_v0 = vmov 0.0   ;;  %v304_v1 = vld [vmem:[%s237_s12] sm:$0xff]  ;;  %v331_v2 = vld [vmem:[#allocation7 + $0x48] sm:$0xff] }
  0x6a   : > { %1740 = vsyncadd (%p2204_p8), [#allocation8], 4294956928  ;;  %273 = vst.msk [vmem:[#allocation2] sm:$0x1] %vm272_vm0, %v1766_v0  ;;  %vm278_vm3 = vcmask 25600   ;;  %vm283_vm4 = vcmask 583200  }
  0x6b   : > { %277 = vst.msk [vmem:[#allocation2 + $0x8] sm:$0xff] %vm275_vm1, %v1766_v0  ;;  %276 = vst.msk [vmem:[#allocation2] sm:$0xff] %vm275_vm1, %v1766_v0  ;;  %s1767_s24 = smov 4   ;;  %v332_v3 = vld [vmem:[#allocation7 + $0x50] sm:$0xff]  ;;  %v333_v4 = vld [vmem:[#allocation7 + $0x58] sm:$0xff]  ;;  %vm314_vm5 = vcmask 556064  }
  0x6c   : > { %274 = vst.msk [vmem:[#allocation2 + $0x11] sm:$0x1] %vm272_vm0, %v1766_v0  ;;  %308 = vrot.lane.b32.xlu0 %v304_v1, %s1767_s24  ;;  %v334_v5 = vld [vmem:[#allocation7 + $0x60] sm:$0xff]  ;;  %v305_v6 = vld [vmem:[%s237_s12 + $0x8] sm:$0xff]  ;;  %v1365_v7 = vpack.c.bf16 %v332_v3, %v331_v2  ;;  %v336_v10 = vld [vmem:[#allocation7 + $0x70] sm:$0xff]  ;;  %vm340_vm6 = vcmask 588800  }
  0x6d   : > { %282 = vst.msk [vmem:[#allocation2 + $0x8] sm:$0xff] %vm280_vm2, %v1766_v0  ;;  %281 = vst.msk [vmem:[#allocation2] sm:$0xff] %vm280_vm2, %v1766_v0  ;;  %v1369_v8 = vpack.c.bf16 %v334_v5, %v333_v4  ;;  %v335_v9 = vld [vmem:[#allocation7 + $0x68] sm:$0xff]  ;;  %v337_v12 = vld [vmem:[#allocation7 + $0x78] sm:$0xff]  ;;  %vm294_vm8 = vcmask 64512   ;;  %vm299_vm9 = vcmask 130112  }
  0x6e   : > { %279 = vst.msk [vmem:[#allocation2 + $0x10] sm:$0x3] %vm278_vm3, %v1766_v0  ;;  %1366 = vmatprep.subr.bf16.mxu0 %v1365_v7  ;;  %v1373_v11 = vpack.c.bf16 %v336_v10, %v335_v9  ;;  %v338_v13 = vld [vmem:[#allocation7 + $0x80] sm:$0xff]  ;;  %v339_v15 = vld [vmem:[#allocation7 + $0x88] sm:$0xff]  ;;  %v321_v22 = vld [vmem:[#allocation7 + $0x10] sm:$0xff]  ;;  %vm297_vm12 = vcmask 58368  }
  0x6f   : > { %284 = vst.msk [vmem:[#allocation2 + $0x10] sm:$0x3] %vm283_vm4, %v1766_v0  ;;  %1368 = vmatpush3.bf16.msra.mxu0 %v1365_v7  ;;  %v1377_v14 = vpack.c.bf16 %v338_v13, %v337_v12  ;;  %v319_v16 = vld [vmem:[#allocation7] sm:$0xff]  ;;  %v320_v17 = vld [vmem:[#allocation7 + $0x8] sm:$0xff]  ;;  %v322_v23 = vld [vmem:[#allocation7 + $0x18] sm:$0xff]  ;;  %v285_v7 = vlaneseq  ;;  %vm302_vm13 = vcmask 123968  }
  0x70   : > { %310 = vrot.lane.b32.xlu0 %v305_v6, %s1767_s24  ;;  %1370 = vmatprep.subr.bf16.mxu0 %v1369_v8  ;;  %v1381_v18 = vpack.c.bf16 %v320_v17, %v319_v16  ;;  %v1385_v24 = vpack.c.bf16 %v322_v23, %v321_v22  ;;  %v323_v26 = vld [vmem:[#allocation7 + $0x20] sm:$0xff]  ;;  %v324_v27 = vld [vmem:[#allocation7 + $0x28] sm:$0xff]  ;;  %v325_v30 = vld [vmem:[#allocation7 + $0x30] sm:$0xff]  ;;  %296 = vst.msk [vmem:[#allocation3 + $0x10] sm:$0xff] %vm294_vm8, %v1766_v0  ;;  %vm707_vm14 = vcmask 1040384   ;;  %s1770_s12 = smov 8  }
  0x71   : > { %v1389_v29 = vpack.c.bf16 %v324_v27, %v323_v26  ;;  %v326_v31 = vld [vmem:[#allocation7 + $0x38] sm:$0xff]  ;;  %v327_v33 = vld [vmem:[#allocation7 + $0x40] sm:$0xff]  ;;  %v506_v34 = vld [vmem:[#allocation7 + $0x90] sm:$0xff]  ;;  %vm287_vm7 = vcmp.lt.s32.totalorder %v285_v7, 144  ;;  %301 = vst.msk [vmem:[#allocation3 + $0x18] sm:$0xff] %vm299_vm9, %v1766_v0  ;;  %vm720_vm15 = vcmask 1047617  }
  0x72   : > { %v1393_v32 = vpack.c.bf16 %v326_v31, %v325_v30  ;;  %v507_v35 = vld [vmem:[#allocation7 + $0x98] sm:$0xff]  ;;  %v508_v36 = vld [vmem:[#allocation7 + $0xa0] sm:$0xff]  ;;  %v509_v37 = vld [vmem:[#allocation7 + $0xa8] sm:$0xff]  ;;  %289 = vst.msk [vmem:[#allocation3] ss:$8 sm:$0x3] %vm287_vm7, %v1766_v0 }
  0x73   : > { %1372 = vmatpush3.bf16.msra.mxu0 %v1369_v8  ;;  %v1397_v38 = vpack.c.bf16 %v507_v35, %v506_v34  ;;  %v1401_v39 = vpack.c.bf16 %v509_v37, %v508_v36  ;;  %v510_v41 = vld [vmem:[#allocation7 + $0xb0] sm:$0xff]  ;;  %v511_v42 = vld [vmem:[#allocation7 + $0xb8] sm:$0xff]  ;;  %v512_v45 = vld [vmem:[#allocation7 + $0xc0] sm:$0xff]  ;;  %292 = vst.msk [vmem:[#allocation3 + $0x21] ss:$8 sm:$0x3] %vm287_vm7, %v1766_v0 }
  0x74   : > { %1374 = vmatprep.subr.bf16.mxu0 %v1373_v11  ;;  %v1405_v44 = vpack.c.bf16 %v511_v42, %v510_v41  ;;  %v513_v46 = vld [vmem:[#allocation7 + $0xc8] sm:$0xff]  ;;  %v514_v48 = vld [vmem:[#allocation7 + $0xd0] sm:$0xff]  ;;  %v735_v8 = vld [vmem:[#allocation9] sm:$0xff]  ;;  %295 = vst.msk [vmem:[#allocation3] sm:$0xff] %vm294_vm8, %v1766_v0  ;;  %vm722_vm0 = vcmask 64513   ;;  %vm724_vm1 = vcmask 1047616  }
  0x75   : > { %v1409_v47 = vpack.c.bf16 %v513_v46, %v512_v45  ;;  %v736_v9 = vld [vmem:[#allocation9 + $0x8] sm:$0xff]  ;;  %v737_v10 = vld [vmem:[#allocation9 + $0x10] sm:$0xff]  ;;  %v738_v13 = vld [vmem:[#allocation9 + $0x18] sm:$0xff]  ;;  %300 = vst.msk [vmem:[#allocation3 + $0x8] sm:$0xff] %vm299_vm9, %v1766_v0  ;;  %vm727_vm2 = vcmask 1040448   ;;  %vm729_vm3 = vcmask 57344  }
  0x76   : > { %v1441_v12 = vpack.c.bf16 %v736_v9, %v735_v8  ;;  %v740_v22 = vld [vmem:[#allocation9 + $0x28] sm:$0xff]  ;;  %v741_v27 = vld [vmem:[#allocation9 + $0x30] sm:$0xff]  ;;  %v764_v30 = vld [vmem:[#allocation9 + $0xc0] sm:$0xff]  ;;  %298 = vst.msk [vmem:[#allocation3 + $0x20] sm:$0x3] %vm297_vm12, %v1766_v0  ;;  %vm795_vm4 = vcmask 130048  }
  0x77   : > { %1376 = vmatpush3.bf16.msra.mxu0 %v1373_v11  ;;  %v1768_v11 = vmov 0.0|0.0   ;;  %v765_v31 = vld [vmem:[#allocation9 + $0xc8] sm:$0xff]  ;;  %v766_v37 = vld [vmem:[#allocation9 + $0xd0] sm:$0xff]  ;;  %v746_v41 = vld [vmem:[#allocation9 + $0x58] sm:$0xff]  ;;  %303 = vst.msk [vmem:[#allocation3 + $0x28] sm:$0x3] %vm302_vm13, %v1766_v0 }
  0x78   : > { %1378 = vmatprep.subr.bf16.mxu0 %v1377_v14  ;;  %1440 = vmatprep.subr.bf16.mxu1 %v1768_v11  ;;  %v744_v34 = vld [vmem:[#allocation9 + $0x48] sm:$0xff]  ;;  %v1423_v35 = vpack.c.bf16 %v765_v31, %v764_v30  ;;  %v747_v46 = vld [vmem:[#allocation9 + $0x60] sm:$0xff]  ;;  %s1268_s8 = sshll.u32 %s1824_s22, 8  ;;  %s1132_s22 = scalar_lea.sflag [#allocation6], %s1984_s14 }
  0x79   : > { %1442 = vmatpush1.bf16.msra.mxu1 %v1441_v12  ;;  %p2205_p0 = scmp.ne.s32.totalorder %s2200_s23, 0 }
  0x7a   : > { %1443 = vmatprep.subr.bf16.mxu1 %v1768_v11 }
  0x7b   : > { %1380 = vmatpush3.bf16.msra.mxu0 %v1377_v14  ;;  %v758_v14 = vld [vmem:[#allocation9 + $0x90] sm:$0xff] }
  0x7c   : > { %1318 = vmatprep.subr.mxu0 %v339_v15 }
  0x7f   : > { %1319 = vmatpush3.msra.mxu0 %v339_v15  ;;  %v759_v15 = vld [vmem:[#allocation9 + $0x98] sm:$0xff] }
  0x80   : > { %1382 = vmatprep.subr.bf16.mxu0 %v1381_v18  ;;  %v1414_v17 = vpack.c.bf16 %v759_v15, %v758_v14 }
  0xde   : > { %v309_v19 = vpop.permute.xlu0 %308 }
  0xdf   : > { %315 = vst.msk [vmem:[#allocation2 + $0x1] sm:$0xff] %vm314_vm5, %v309_v19  ;;  %v1444_v19 = vpack.c.bf16 %v738_v13, %v737_v10 }
  0xe1   : > { %1445 = vmatpush1.bf16.msra.mxu1 %v1444_v19 }
  0xe2   : > { %v311_v20 = vpop.permute.xlu0 %310  ;;  %1446 = vmatprep.subr.bf16.mxu1 %v1768_v11 }
  0xe3   : > { %316 = vst.msk [vmem:[#allocation2 + $0x9] sm:$0xff] %vm314_vm5, %v311_v20  ;;  %v761_v20 = vld [vmem:[#allocation9 + $0xa8] sm:$0xff]  ;;  %vm782_vm5 = vcmask 1046528  }
  0xe6   : > { %v328_v21 = vld [vmem:[#allocation2 + $0x1] sm:$0xff] }
  0xe7   : > { %1320 = vmatprep.mubr.msk.f32.mxu0 %vm340_vm6, %v328_v21  ;;  %v317_v28 = vld [vmem:[#allocation2] sm:$0xff] }
  0xe8   : > { %v739_v21 = vld [vmem:[#allocation9 + $0x20] sm:$0xff] }
  0xe9   : > { %v1447_v26 = vpack.c.bf16 %v740_v22, %v739_v21 }
  0xea   : > { %v329_v25 = vld [vmem:[#allocation2 + $0x9] sm:$0xff] }
  0xeb   : > { %1321 = vmatmul.mubr.msk.f32.vlgmr.msra.gmra.mrb[0].mxu0 %vm340_vm6, %v329_v25  ;;  %v318_v40 = vld [vmem:[#allocation2 + $0x8] sm:$0xff]  ;;  %v763_v25 = vld [vmem:[#allocation9 + $0xb8] sm:$0xff]  ;;  %1448 = vmatpush1.bf16.msra.mxu1 %v1447_v26 }
  0xec   : > { %1384 = vmatpush3.bf16.msra.mxu0 %v1381_v18  ;;  %1341 = vmatprep.mubr.msk.f32.mxu0 %vm340_vm6, %v317_v28  ;;  %v503_v43 = vld [vmem:[#allocation2 + $0x2] sm:$0xff]  ;;  %v504_v49 = vld [vmem:[#allocation2 + $0xa] sm:$0xff]  ;;  %v742_v28 = vld [vmem:[#allocation9 + $0x38] sm:$0xff] }
  0xed   : > { %1386 = vmatprep.subr.bf16.mxu0 %v1385_v24  ;;  %v760_v18 = vld [vmem:[#allocation9 + $0xa0] sm:$0xff]  ;;  %1449 = vmatprep.subr.bf16.mxu1 %v1768_v11 }
  0xee   : > { %v1417_v23 = vpack.c.bf16 %v761_v20, %v760_v18 }
  0xf0   : > { %1388 = vmatpush3.bf16.msra.mxu0 %v1385_v24  ;;  %v762_v24 = vld [vmem:[#allocation9 + $0xb0] sm:$0xff] }
  0xf1   : > { %1390 = vmatprep.subr.bf16.mxu0 %v1389_v29 }
  0xf4   : > { %1392 = vmatpush3.bf16.msra.mxu0 %v1389_v29  ;;  %v1420_v29 = vpack.c.bf16 %v763_v25, %v762_v24 }
  0xf5   : > { %1394 = vmatprep.subr.bf16.mxu0 %v1393_v32 }
  0xf8   : > { %1396 = vmatpush3.bf16.msra.mxu0 %v1393_v32  ;;  %v1450_v32 = vpack.c.bf16 %v742_v28, %v741_v27 }
  0xf9   : > { %1339 = vmatprep.subr.mxu0 %v327_v33 }
  0xfa   : > { %1451 = vmatpush1.bf16.msra.mxu1 %v1450_v32 }
  0xfb   : > { %1452 = vmatprep.subr.bf16.mxu1 %v1768_v11 }
  0xfc   : > { %1340 = vmatpush3.msra.mxu0 %v327_v33  ;;  %v743_v33 = vld [vmem:[#allocation9 + $0x40] sm:$0xff] }
  0xfd   : > { %1342 = vmatmul.mubr.msk.f32.vlgmr.msra.gmra.mrb[0].mxu0 %vm340_vm6, %v318_v40  ;;  %1398 = vmatprep.subr.bf16.mxu0 %v1397_v38  ;;  %v745_v40 = vld [vmem:[#allocation9 + $0x50] sm:$0xff] }
  0xfe   : > { %1400 = vmatpush3.bf16.msra.mxu0 %v1397_v38  ;;  %1362 = vmatprep.mubr.msk.f32.mxu0 %vm340_vm6, %v503_v43  ;;  %v767_v38 = vld [vmem:[#allocation9 + $0xd8] sm:$0xff]  ;;  %v768_v43 = vld [vmem:[#allocation9 + $0xe0] sm:$0xff]  ;;  %v1456_v45 = vpack.c.bf16 %v746_v41, %v745_v40  ;;  %v770_v41 = vld [vmem:[#allocation9 + $0xf0] sm:$0xff] }
  0xff   : > { %1402 = vmatprep.subr.bf16.mxu0 %v1401_v39  ;;  %v1426_v42 = vpack.c.bf16 %v767_v38, %v766_v37  ;;  %v750_v37 = vld [vmem:[#allocation9 + $0x78] sm:$0xff] }
 0x102   : > { %1404 = vmatpush3.bf16.msra.mxu0 %v1401_v39  ;;  %v1453_v39 = vpack.c.bf16 %v744_v34, %v743_v33 }
 0x103   : > { %1406 = vmatprep.subr.bf16.mxu0 %v1405_v44 }
 0x104   : > { %1454 = vmatpush1.bf16.msra.mxu1 %v1453_v39 }
 0x105   : > { %1455 = vmatprep.subr.bf16.mxu1 %v1768_v11 }
 0x106   : > { %1408 = vmatpush3.bf16.msra.mxu0 %v1405_v44  ;;  %v769_v44 = vld [vmem:[#allocation9 + $0xe8] sm:$0xff] }
 0x107   : > { %1410 = vmatprep.subr.bf16.mxu0 %v1409_v47 }
 0x108   : > { %1457 = vmatpush1.bf16.msra.mxu1 %v1456_v45 }
 0x109   : > { %1458 = vmatprep.subr.bf16.mxu1 %v1768_v11 }
 0x10a   : > { %1412 = vmatpush3.bf16.msra.mxu0 %v1409_v47  ;;  %v748_v47 = vld [vmem:[#allocation9 + $0x68] sm:$0xff] }
 0x10b   : > { %1360 = vmatprep.subr.mxu0 %v514_v48 }
 0x10e   : > { %1361 = vmatpush3.msra.mxu0 %v514_v48  ;;  %v1429_v48 = vpack.c.bf16 %v769_v44, %v768_v43 }
 0x10f   : > { %1363 = vmatmul.mubr.msk.f32.vlgmr.msra.gmra.mrb[0].mxu0 %vm340_vm6, %v504_v49  ;;  %1413 = vmatprep.subr.bf16.mxu0 %v1768_v11  ;;  %v1459_v49 = vpack.c.bf16 %v748_v47, %v747_v46  ;;  %vm982_vm6 = vcmask 1045504  }
 0x110   : > { %1415 = vmatpush1.bf16.msra.mxu0 %v1414_v17 }
 0x111   : > { %1416 = vmatprep.subr.bf16.mxu0 %v1768_v11  ;;  %1460 = vmatpush1.bf16.msra.mxu1 %v1459_v49  ;;  %v752_v49 = vld [vmem:[#allocation9 + $0x88] sm:$0xff] }
 0x112   : > { %1461 = vmatprep.subr.bf16.mxu1 %v1768_v11 }
 0x114   : > { %1418 = vmatpush1.bf16.msra.mxu0 %v1417_v23 }
 0x115   : > { %1419 = vmatprep.subr.bf16.mxu0 %v1768_v11 }
 0x118   : > { %1421 = vmatpush1.bf16.msra.mxu0 %v1420_v29 }
 0x119   : > { %1422 = vmatprep.subr.bf16.mxu0 %v1768_v11 }
 0x11c   : > { %1424 = vmatpush1.bf16.msra.mxu0 %v1423_v35 }
 0x11d   : > { %1425 = vmatprep.subr.bf16.mxu0 %v1768_v11 }
 0x120   : > { %1427 = vmatpush1.bf16.msra.mxu0 %v1426_v42  ;;  %v771_v42 = vld [vmem:[#allocation9 + $0xf8] sm:$0xff] }
 0x121   : > { %1428 = vmatprep.subr.bf16.mxu0 %v1768_v11  ;;  %v1432_v45 = vpack.c.bf16 %v771_v42, %v770_v41 }
 0x124   : > { %1430 = vmatpush1.bf16.msra.mxu0 %v1429_v48  ;;  %v751_v48 = vld [vmem:[#allocation9 + $0x80] sm:$0xff] }
 0x125   : > { %1431 = vmatprep.subr.bf16.mxu0 %v1768_v11 }
 0x128   : > { %1433 = vmatpush1.bf16.msra.mxu0 %v1432_v45 }
 0x129   : > { %1434 = vmatprep.subr.bf16.mxu0 %v1768_v11 }
 0x1e2   : > { %v2012_v50 = vpop.f32.mrb[0].mxu0 }
 0x1e3   : > { %v2014_v51 = vpop.f32.mrb[1].mxu0  ;;  %v609_v52 = vmul.f32 %v2012_v50, %v2012_v50 }
 0x1e4   : > { %v598_v53 = vadd.f32 %v2012_v50, %v2014_v51  ;;  %v608_v54 = vmul.f32 %v2014_v51, %v2014_v51 }
 0x1e6   : > { %599 = vadd.xlane.f32.xlu1 %v598_v53  ;;  %v610_v55 = vadd.f32 %v609_v52, %v608_v54  ;;  %v637_v52 = vshrl.u32 %v285_v7, 7  ;;  %v628_v53 = vld [vmem:[%s2189_s3] sm:$0x1] }
 0x1e8   : > { %v2054_v54 = vsub.s32 0, %v637_v52  ;;  %v1769_v52 = vmov -1.0  }
 0x1ea   : > { %611 = vadd.xlane.f32.xlu1 %v610_v55 }
 0x273   : > { %v600_v56 = vpop.xlane.xlu1 %599 }
 0x274   : > { %v601_v57 = vrot.slane %v600_v56, 4 }
 0x276   : > { %v602_v58 = vadd.f32 %v601_v57, %v600_v56 }
 0x277   : > { %v612_v59 = vpop.xlane.xlu1 %611 }
 0x278   : > { %v603_v60 = vrot.slane %v602_v58, 2  ;;  %v613_v61 = vrot.slane %v612_v59, 4 }
 0x27a   : > { %v614_v62 = vadd.f32 %v613_v61, %v612_v59  ;;  %v604_v63 = vadd.f32 %v603_v60, %v602_v58  ;;  %v631_v58 = vld [vmem:[%s2190_s4] sm:$0x1] }
 0x27c   : > { %v615_v1 = vrot.slane %v614_v62, 2  ;;  %v605_v2 = vrot.slane %v604_v63, 1 }
 0x27e   : > { %v606_v3 = vadd.f32 %v605_v2, %v604_v63  ;;  %v616_v4 = vadd.f32 %v615_v1, %v614_v62 }
 0x280   : > { %1504 = vpush %v606_v3  ;;  %v617_v5 = vrot.slane %v616_v4, 1 }
 0x282   : > { %v618_v6 = vadd.f32 %v617_v5, %v616_v4 }
 0x284   : > { %1506 = vpush %v618_v6 }
 0x2b1   : > { %s1505_s26 = spop %1504 }
 0x2b2   : > { %s2022_s15 = smul.f32 0.00048828125, %s1505_s26 }
 0x2b4   : > { %s622_s16 = smul.f32 %s2022_s15, %s2022_s15  ;;  %v632_v57 = vstv %s2022_s15 }
 0x2b5   : > { %s1507_s10 = spop %1506 }
 0x2b6   : > { %s621_s28 = smul.f32 0.00048828125, %s1507_s10 }
 0x2b8   : > { %s623_s13 = ssub.f32 %s621_s28, %s622_s16 }
 0x2ba   : > { %s624_s9 = sadd.f32 1e-05, %s623_s13 }
 0x2bc   : > { %v625_v16 = vstv %s624_s9 }
 0x2bd   : > { %1591 = vrsqrt.f32 %v625_v16 }
 0x2c7   : > { %v1592_v36 = vpop.eup %1591 }
 0x2c8   : > { %1508 = vpush %v1592_v36  ;;  %v749_v36 = vld [vmem:[#allocation9 + $0x70] sm:$0xff] }
 0x2c9   : > { %v1462_v40 = vpack.c.bf16 %v750_v37, %v749_v36 }
 0x2cb   : > { %1463 = vmatpush1.bf16.msra.mxu1 %v1462_v40 }
 0x2cc   : > { %1464 = vmatprep.subr.bf16.mxu1 %v1768_v11 }
 0x2f9   : > { %s1509_s17 = spop %1508 }
 0x2fa   : > { %v629_v55 = vstv %s1509_s17 }
 0x2fb   : > { %v630_v56 = vmul.f32 %v629_v55, %v628_v53 }
 0x2fd   : > { %v633_v59 = vmul.f32 %v632_v57, %v630_v56  ;;  %v639_v60 = vrot.slane %v630_v56, %v2054_v54  ;;  %v1465_v56 = vpack.c.bf16 %v752_v49, %v751_v48  ;;  %v772_v57 = vld [vmem:[#allocation9 + $0x100] sm:$0xff]  ;;  %v969_v48 = vld [vmem:[#allocation9 + $0x168] sm:$0xff] }
 0x2ff   : > { %v634_v61 = vsub.f32 %v631_v58, %v633_v59  ;;  %v641_v62 = vmul.f32 %v639_v60, %v2014_v51  ;;  %v642_v63 = vmul.f32 %v2012_v50, %v639_v60  ;;  %v773_v58 = vld [vmem:[#allocation9 + $0x108] sm:$0xff]  ;;  %1466 = vmatpush1.bf16.msra.mxu1 %v1465_v56  ;;  %v972_v56 = vld [vmem:[#allocation9 + $0x180] sm:$0xff] }
 0x300   : > { %1467 = vmatprep.subr.bf16.mxu1 %v1768_v11 }
 0x301   : > { %v647_v1 = vrot.slane %v634_v61, %v2054_v54  ;;  %v1435_v61 = vpack.c.bf16 %v773_v58, %v772_v57  ;;  %v973_v57 = vld [vmem:[#allocation9 + $0x188] sm:$0xff] }
 0x302   : > { %v1486_v58 = vpack.c.bf16 %v973_v57, %v972_v56 }
 0x303   : > { %v2064_v2 = vadd.f32 %v647_v1, %v641_v62  ;;  %v2066_v3 = vadd.f32 %v647_v1, %v642_v63  ;;  %1436 = vmatpush1.bf16.msra.mxu0 %v1435_v61 }
 0x304   : > { %1437 = vmatprep.subr.bf16.mxu0 %v1768_v11 }
 0x305   : > { %v653_v4 = vmul.f32 0.70710677, %v2064_v2  ;;  %v2070_v5 = vmul.f32 0.70710677, %v2066_v3  ;;  %v651_v0 = vmul.f32 0.5, %v2064_v2  ;;  %v652_v1 = vmul.f32 0.5, %v2066_v3 }
 0x307   : > { %v659_v6 = vand.u32 2147483647, %v653_v4  ;;  %v660_v7 = vand.u32 2147483647, %v2070_v5  ;;  %vm655_vm10 = vcmp.ge.f32.partialorder %v653_v4, 0.0  ;;  %vm656_vm11 = vcmp.ge.f32.partialorder %v2070_v5, 0.0 }
 0x308   : > { %v657_v53 = vsel %vm655_vm10, 1.0, %v1769_v52  ;;  %v658_v59 = vsel %vm656_vm11, 1.0, %v1769_v52  ;;  %v970_v52 = vld [vmem:[#allocation9 + $0x170] sm:$0xff] }
 0x309   : > { %v661_v8 = vmul.f32 0.3275911, %v659_v6  ;;  %v662_v9 = vmul.f32 0.3275911, %v660_v7  ;;  %v687_v50 = vsub.f32 0.0, %v659_v6  ;;  %v688_v12 = vsub.f32 0.0, %v660_v7 }
 0x30b   : > { %v663_v10 = vadd.f32 1.0, %v661_v8  ;;  %v664_v51 = vadd.f32 1.0, %v662_v9  ;;  %v689_v14 = vmul.f32 %v687_v50, %v659_v6  ;;  %v690_v16 = vmul.f32 %v688_v12, %v660_v7  ;;  %v774_v6 = vld [vmem:[#allocation9 + $0x110] sm:$0xff]  ;;  %v775_v7 = vld [vmem:[#allocation9 + $0x118] sm:$0xff] }
 0x30c   : > { %v1438_v5 = vpack.c.bf16 %v775_v7, %v774_v6 }
 0x30d   : > { %1593 = vrcp.f32 %v663_v10  ;;  %v691_v20 = vmul.f32 1.442695, %v689_v14  ;;  %v693_v22 = vmul.f32 1.442695, %v690_v16  ;;  %v961_v14 = vld [vmem:[#allocation9 + $0x128] sm:$0xff]  ;;  %v962_v16 = vld [vmem:[#allocation9 + $0x130] sm:$0xff] }
 0x30e   : > { %1595 = vrcp.f32 %v664_v51  ;;  %1439 = vmatpush1.bf16.msra.mxu0 %v1438_v5 }
 0x30f   : > { %1597 = vpow2.f32 %v691_v20 }
 0x310   : > { %1599 = vpow2.f32 %v693_v22 }
 0x317   : > { %v1594_v13 = vpop.eup %1593 }
 0x318   : > { %v1596_v15 = vpop.eup %1595  ;;  %v669_v17 = vmul.f32 1.0614054, %v1594_v13 }
 0x319   : > { %v670_v18 = vmul.f32 1.0614054, %v1596_v15  ;;  %v1598_v38 = vpop.eup %1597 }
 0x31a   : > { %v671_v19 = vadd.f32 -1.4531521, %v669_v17  ;;  %v1600_v43 = vpop.eup %1599  ;;  %v963_v17 = vld [vmem:[#allocation9 + $0x138] sm:$0xff] }
 0x31b   : > { %v672_v21 = vadd.f32 -1.4531521, %v670_v18 }
 0x31c   : > { %v673_v23 = vmul.f32 %v1594_v13, %v671_v19 }
 0x31d   : > { %v674_v24 = vmul.f32 %v1596_v15, %v672_v21 }
 0x31e   : > { %v675_v25 = vadd.f32 1.4214138, %v673_v23 }
 0x31f   : > { %v676_v26 = vadd.f32 1.4214138, %v674_v24 }
 0x320   : > { %v677_v27 = vmul.f32 %v1594_v13, %v675_v25 }
 0x321   : > { %v678_v28 = vmul.f32 %v1596_v15, %v676_v26 }
 0x322   : > { %v679_v29 = vadd.f32 -0.28449672, %v677_v27  ;;  %v1471_v27 = vpack.c.bf16 %v963_v17, %v962_v16 }
 0x323   : > { %v680_v30 = vadd.f32 -0.28449672, %v678_v28 }
 0x324   : > { %v681_v31 = vmul.f32 %v1594_v13, %v679_v29 }
 0x325   : > { %v682_v32 = vmul.f32 %v1596_v15, %v680_v30 }
 0x326   : > { %v683_v33 = vadd.f32 0.2548296, %v681_v31 }
 0x327   : > { %v684_v34 = vadd.f32 0.2548296, %v682_v32  ;;  %v964_v32 = vld [vmem:[#allocation9 + $0x140] sm:$0xff] }
 0x328   : > { %v685_v35 = vmul.f32 %v1594_v13, %v683_v33  ;;  %v960_v13 = vld [vmem:[#allocation9 + $0x120] sm:$0xff] }
 0x329   : > { %v686_v39 = vmul.f32 %v1596_v15, %v684_v34  ;;  %v1468_v15 = vpack.c.bf16 %v961_v14, %v960_v13 }
 0x32a   : > { %v695_v44 = vmul.f32 %v1598_v38, %v685_v35  ;;  %v965_v35 = vld [vmem:[#allocation9 + $0x148] sm:$0xff] }
 0x32b   : > { %v696_v46 = vmul.f32 %v1600_v43, %v686_v39  ;;  %v1474_v42 = vpack.c.bf16 %v965_v35, %v964_v32  ;;  %v966_v43 = vld [vmem:[#allocation9 + $0x150] sm:$0xff] }
 0x32c   : > { %v697_v47 = vsub.f32 1.0, %v695_v44  ;;  %v967_v44 = vld [vmem:[#allocation9 + $0x158] sm:$0xff] }
 0x32d   : > { %v698_v55 = vsub.f32 1.0, %v696_v46  ;;  %v1477_v46 = vpack.c.bf16 %v967_v44, %v966_v43  ;;  %v1109_v43 = vld [vmem:[%s2190_s4] sm:$0x1] }
 0x32e   : > { %v699_v60 = vmul.f32 %v697_v47, %v657_v53  ;;  %v968_v47 = vld [vmem:[#allocation9 + $0x160] sm:$0xff]  ;;  %v971_v53 = vld [vmem:[#allocation9 + $0x178] sm:$0xff] }
 0x32f   : > { %v700_v62 = vmul.f32 %v698_v55, %v658_v59  ;;  %v1480_v49 = vpack.c.bf16 %v969_v48, %v968_v47  ;;  %v1483_v55 = vpack.c.bf16 %v971_v53, %v970_v52  ;;  %v974_v59 = vld [vmem:[#allocation9 + $0x190] sm:$0xff] }
 0x330   : > { %v701_v63 = vadd.f32 1.0, %v699_v60  ;;  %v975_v60 = vld [vmem:[#allocation9 + $0x198] sm:$0xff] }
 0x331   : > { %v702_v4 = vadd.f32 1.0, %v700_v62  ;;  %v1489_v61 = vpack.c.bf16 %v975_v60, %v974_v59  ;;  %v976_v62 = vld [vmem:[#allocation9 + $0x1a0] sm:$0xff] }
 0x332   : > { %v703_v8 = vmul.f32 %v701_v63, %v651_v0  ;;  %v977_v0 = vld [vmem:[#allocation9 + $0x1a8] sm:$0xff] }
 0x333   : > { %v704_v9 = vmul.f32 %v702_v4, %v652_v1  ;;  %v1492_v1 = vpack.c.bf16 %v977_v0, %v976_v62 }
 0x334   : > { %v708_v10 = vrot.slane %v703_v8, 7 }
 0x335   : > { %v709_v51 = vrot.slane %v704_v9, 7 }
 0x336   : > { %711 = vrot.lane.b32.xlu0 %v708_v10, %s1770_s12 }
 0x337   : > { %v710_v2 = vsel %vm707_vm14, %v708_v10, %v709_v51 }
 0x338   : > { %713 = vrot.lane.b32.xlu1 %v710_v2, %s1770_s12 }
 0x33a   : > { %715 = vrot.lane.b32.xlu0 %v709_v51, %s1770_s12 }
 0x3a8   : > { %v712_v3 = vpop.permute.xlu0 %711 }
 0x3a9   : > { %721 = vst.msk [vmem:[#allocation3] sm:$0xfe] %vm720_vm15, %v712_v3 }
 0x3aa   : > { %723 = vst.msk [vmem:[#allocation3 + $0x8] sm:$0xfe] %vm722_vm0, %v712_v3  ;;  %v714_v50 = vpop.permute.xlu1 %713 }
 0x3ab   : > { %725 = vst.msk [vmem:[#allocation3 + $0x10] sm:$0xff] %vm724_vm1, %v714_v50 }
 0x3ac   : > { %726 = vst.msk [vmem:[#allocation3 + $0x18] sm:$0xff] %vm294_vm8, %v714_v50  ;;  %v716_v12 = vpop.permute.xlu0 %715 }
 0x3ad   : > { %728 = vst.msk [vmem:[#allocation3 + $0x20] sm:$0x1] %vm727_vm2, %v716_v12 }
 0x3ae   : > { %730 = vst.msk [vmem:[#allocation3 + $0x28] sm:$0x1] %vm729_vm3, %v716_v12 }
 0x3b0   : > { %v731_v19 = vld [vmem:[#allocation3] sm:$0xff] }
 0x3b1   : > { %v732_v18 = vld [vmem:[#allocation3 + $0x8] sm:$0xff]  ;;  %v753_v22 = vld [vmem:[#allocation3] sm:$0xfe] }
 0x3b2   : > { %v754_v20 = vld [vmem:[#allocation3 + $0x8] sm:$0xfe]  ;;  %1258 = vmatprep.mubr.msk.f32.mxu1 %vm795_vm4, %v732_v18  ;;  %v2092_v25 = vld [vmem:[#allocation3 + $0x10] sm:$0xff]  ;;  %v783_v26 = vrot.slane %v753_v22, 1  ;;  %v955_v63 = vld [vmem:[#allocation3] sm:$0xfc] }
 0x3b3   : > { %v786_v21 = vrot.slane %v754_v20, 1  ;;  %v956_v23 = vld [vmem:[#allocation3 + $0x8] sm:$0xfc]  ;;  %945 = vmatmul.mubr.f32.vlgmr.msra.gmra.mrb[0].mxu1 %v731_v19  ;;  %v2090_v24 = vld [vmem:[#allocation3 + $0x18] sm:$0xff]  ;;  %v784_v30 = vrot.slane %v2092_v25, 1  ;;  %v983_v6 = vrot.slane %v955_v63, 2 }
 0x3b4   : > { %1469 = vmatpush1.bf16.msra.mxu1 %v1468_v15  ;;  %v787_v28 = vrot.slane %v2090_v24, 1  ;;  %1259 = vmatprep.mubr.msk.f32.mxu1 %vm795_vm4, %v2090_v24  ;;  %v987_v29 = vrot.slane %v2090_v24, 2  ;;  %v986_v31 = vrot.slane %v956_v23, 2  ;;  %v755_v34 = vld [vmem:[#allocation3 + $0x20] sm:$0x1]  ;;  %v984_v7 = vrot.slane %v2092_v25, 2 }
 0x3b5   : > { %1470 = vmatprep.subr.bf16.mxu1 %v1768_v11  ;;  %v756_v33 = vld [vmem:[#allocation3 + $0x28] sm:$0x1]  ;;  %v785_v37 = vsel %vm782_vm5, %v783_v26, %v784_v30  ;;  %v789_v39 = vrot.slane %v755_v34, 1  ;;  %v957_v5 = vld [vmem:[#allocation3 + $0x20] sm:$0x3] }
 0x3b6   : > { %v788_v36 = vsel %vm782_vm5, %v786_v21, %v787_v28  ;;  %v791_v38 = vrot.slane %v756_v33, 1  ;;  %v988_v40 = vsel %vm982_vm6, %v986_v31, %v987_v29  ;;  %v958_v4 = vld [vmem:[#allocation3 + $0x28] sm:$0x3]  ;;  %v985_v9 = vsel %vm982_vm6, %v983_v6, %v984_v7 }
 0x3b7   : > { %1256 = vmatprep.mubr.msk.f32.mxu0 %vm795_vm4, %v788_v36  ;;  %950 = vmatmul.mubr.f32.gmra.mrb[2].mxu1 %v2092_v25  ;;  %v790_v45 = vsel %vm782_vm5, %v784_v30, %v789_v39  ;;  %v991_v8 = vrot.slane %v958_v4, 2  ;;  %v989_v10 = vrot.slane %v957_v5, 2  ;;  %v1106_v39 = vld [vmem:[%s2189_s3] sm:$0x1] }
 0x3b8   : > { %865 = vmatmul.mubr.f32.vlgmr.msra.gmra.mrb[2].mxu0 %v785_v37  ;;  %1472 = vmatpush1.bf16.msra.mxu1 %v1471_v27  ;;  %v792_v41 = vsel %vm782_vm5, %v787_v28, %v791_v38 }
 0x3b9   : > { %1260 = vmatprep.mubr.msk.f32.mxu1 %vm795_vm4, %v988_v40  ;;  %1257 = vmatprep.mubr.msk.f32.mxu0 %vm795_vm4, %v792_v41  ;;  %v992_v51 = vsel %vm982_vm6, %v987_v29, %v991_v8  ;;  %v990_v2 = vsel %vm982_vm6, %v984_v7, %v989_v10 }
 0x3ba   : > { %1473 = vmatprep.subr.bf16.mxu1 %v1768_v11 }
 0x3bc   : > { %870 = vmatmul.mubr.f32.gmra.mrb[4].mxu0 %v790_v45  ;;  %1475 = vmatpush1.bf16.msra.mxu1 %v1474_v42 }
 0x3bd   : > { %1476 = vmatprep.subr.bf16.mxu1 %v1768_v11 }
 0x3c0   : > { %1478 = vmatpush1.bf16.msra.mxu1 %v1477_v46 }
 0x3c1   : > { %1479 = vmatprep.subr.bf16.mxu1 %v1768_v11 }
 0x3c4   : > { %1481 = vmatpush1.bf16.msra.mxu1 %v1480_v49 }
 0x3c5   : > { %1482 = vmatprep.subr.bf16.mxu1 %v1768_v11 }
 0x3c8   : > { %1484 = vmatpush1.bf16.msra.mxu1 %v1483_v55 }
 0x3c9   : > { %1485 = vmatprep.subr.bf16.mxu1 %v1768_v11 }
 0x3cc   : > { %1487 = vmatpush1.bf16.msra.mxu1 %v1486_v58 }
 0x3cd   : > { %1488 = vmatprep.subr.bf16.mxu1 %v1768_v11 }
 0x3d0   : > { %1490 = vmatpush1.bf16.msra.mxu1 %v1489_v61 }
 0x3d1   : > { %1491 = vmatprep.subr.bf16.mxu1 %v1768_v11 }
 0x3d4   : > { %1493 = vmatpush1.bf16.msra.mxu1 %v1492_v1 }
 0x3d7   : > { %1064 = vmatmul.mubr.f32.vlgmr.msra.gmra.mrb[0].mxu1 %v985_v9 }
 0x3d8   : > { %1261 = vmatprep.mubr.msk.f32.mxu1 %vm795_vm4, %v992_v51 }
 0x3db   : > { %1069 = vmatmul.mubr.f32.gmra.mrb[2].mxu1 %v990_v2 }
 0x48b   : > { %v866_v11 = vpop.f32.mrb[2].mxu0 }
 0x48c   : > { %v868_v3 = vpop.f32.mrb[3].mxu0 }
 0x48f   : > { %v871_v50 = vpop.f32.mrb[4].mxu0 }
 0x490   : > { %v873_v12 = vpop.f32.mrb[5].mxu0 }
 0x4aa   : > { %v1065_v13 = vpop.f32.mrb[0].mxu1 }
 0x4ab   : > { %v1494_v14 = vadd.f32 %v1065_v13, %v866_v11  ;;  %v1067_v15 = vpop.f32.mrb[1].mxu1 }
 0x4ad   : > { %v1086_v20 = vmul.f32 %v1494_v14, %v1494_v14 }
 0x4ae   : > { %v1070_v16 = vpop.f32.mrb[2].mxu1 }
 0x4af   : > { %v1495_v17 = vadd.f32 %v1070_v16, %v871_v50  ;;  %v1072_v18 = vpop.f32.mrb[3].mxu1 }
 0x4b1   : > { %v1076_v19 = vadd.f32 %v1495_v17, %v1494_v14  ;;  %v1087_v21 = vmul.f32 %v1495_v17, %v1495_v17 }
 0x4b3   : > { %1077 = vadd.xlane.f32.xlu0 %v1076_v19  ;;  %v1088_v22 = vadd.f32 %v1087_v21, %v1086_v20 }
 0x4b5   : > { %1089 = vadd.xlane.f32.xlu1 %v1088_v22 }
 0x540   : > { %v1078_v23 = vpop.xlane.xlu0 %1077 }
 0x541   : > { %v1079_v24 = vrot.slane %v1078_v23, 4 }
 0x542   : > { %v1090_v25 = vpop.xlane.xlu1 %1089 }
 0x543   : > { %v1080_v26 = vadd.f32 %v1079_v24, %v1078_v23  ;;  %v1091_v27 = vrot.slane %v1090_v25, 4 }
 0x545   : > { %v1081_v28 = vrot.slane %v1080_v26, 2  ;;  %v1092_v29 = vadd.f32 %v1091_v27, %v1090_v25 }
 0x547   : > { %v1082_v30 = vadd.f32 %v1081_v28, %v1080_v26  ;;  %v1093_v31 = vrot.slane %v1092_v29, 2 }
 0x549   : > { %v1094_v32 = vadd.f32 %v1093_v31, %v1092_v29  ;;  %v1083_v33 = vrot.slane %v1082_v30, 1 }
 0x54b   : > { %v1084_v34 = vadd.f32 %v1083_v33, %v1082_v30  ;;  %v1095_v35 = vrot.slane %v1094_v32, 1 }
 0x54d   : > { %1510 = vpush %v1084_v34  ;;  %v1096_v36 = vadd.f32 %v1095_v35, %v1094_v32 }
 0x54f   : > { %1512 = vpush %v1096_v36 }
 0x57e   : > { %s1511_s24 = spop %1510 }
 0x57f   : > { %s1098_s26 = smul.f32 0.00048828125, %s1511_s24  ;;  %s271_s24 = scalar_lea.vmem [#allocation10], %s1246_s6 }
 0x580   : > { %s1513_s15 = spop %1512 }
 0x581   : > { %s1100_s16 = smul.f32 %s1098_s26, %s1098_s26  ;;  %v1110_v42 = vstv %s1098_s26 }
 0x582   : > { %s1099_s10 = smul.f32 0.00048828125, %s1513_s15  ;;  %s1145_s15 = sshll.u32 %s271_s24, 4  ;;  %s2141_s15 = int_to_ptr.vmem [resolvable:$true] %s1145_s15 }
 0x583   : > { %s1689_s6 = scalar_lea.vmem %s2141_s15, 256 }
 0x584   : > { %s1101_s28 = ssub.f32 %s1099_s10, %s1100_s16  ;;  %s2139_s10 = scalar_lea.hbm %s2191_s5, %s1268_s8 }
 0x585   : > { %p1690_p11 = scmp.ne.s32.totalorder %s2141_s15, %s1689_s6 }
 0x586   : > { %s1102_s13 = sadd.f32 1e-05, %s1101_s28  ;;  %s1771_s28 = smov [#allocation10]  }
 0x587   : > { %p1691_p2 = pnand %p1690_p11, %p2205_p0 }
 0x588   : > { %v1103_v37 = vstv %s1102_s13  ;;  %s1693_s13 = sshll.u32 %s1771_s28, 4  ;;  %s1694_s13 = int_to_ptr.vmem [resolvable:$false] %s1693_s13 }
 0x589   : > { %1601 = vrsqrt.f32 %v1103_v37  ;;  %p1692_p3 = pneg %p1691_p2  ;;  %s1695_s9 = scalar_lea.vmem %s1694_s13, 512 }
 0x58a   : > { %p1696_p7 = scmp.lt.s32.totalorder %s2141_s15, %s1694_s13  ;;  %p1697_p9 = scmp.lt.s32.totalorder %s1695_s9, %s1689_s6 }
 0x58c   : > { %p1698_p12 = por %p1697_p9, %p1696_p7 }
 0x58e   : > { %p1699_p1 = pnand %p1698_p12, %p1692_p3 }
 0x593   : > { %v1602_v38 = vpop.eup %1601 }
 0x594   : > { %1514 = vpush %v1602_v38 }
 0x5c5   : > { %s1515_s11 = spop %1514 }
 0x5c6   : > { %v1107_v40 = vstv %s1515_s11 }
 0x5c7   : > { %v1108_v41 = vmul.f32 %v1107_v40, %v1106_v39 }
 0x5c9   : > { %v1111_v44 = vmul.f32 %v1110_v42, %v1108_v41  ;;  %v1117_v45 = vrot.slane %v1108_v41, %v2054_v54 }
 0x5cb   : > { %v1112_v46 = vsub.f32 %v1109_v43, %v1111_v44  ;;  %v1119_v47 = vmul.f32 %v1494_v14, %v1117_v45  ;;  %v1120_v48 = vmul.f32 %v1495_v17, %v1117_v45 }
 0x5cd   : > { %v1125_v49 = vrot.slane %v1112_v46, %v2054_v54 }
 0x5cf   : > { %v1127_v52 = vadd.f32 %v1125_v49, %v1119_v47  ;;  %v1128_v53 = vadd.f32 %v1125_v49, %v1120_v48 }
 0x5d1   : > { %1129 = vst [vmem:[%s271_s24] sm:$0xff] %v1127_v52  ;;  %1130 = vst [vmem:[%s271_s24 + $0x8] sm:$0xff] %v1128_v53 }
 0x5d2   : > { %1702 = shalt.err (!%p1699_p1)
}
 0x5d3   : > { %s1703_s30 = scalar_lea.hbm %s2139_s10, 256  ;;  %s1707_s7 = scalar_lea.hbm %s2191_s5, 512 }
 0x5d4   : > { %p1704_p13 = scmp.ne.s32.totalorder %s2139_s10, %s1703_s30  ;;  %p1708_p4 = scmp.lt.u32.totalorder %s2139_s10, %s2191_s5 }
 0x5d5   : > { %p1709_p5 = scmp.lt.u32.totalorder %s1707_s7, %s1703_s30  ;;  %p1711_p11 = scmp.lt.u32.totalorder %s1703_s30, %s2139_s10 }
 0x5d6   : > { %p1705_p6 = pnand %p1704_p13, %p2205_p0 }
 0x5d7   : > { %p1710_p8 = por %p1709_p5, %p1708_p4 }
 0x5d8   : > { %p1706_p10 = pneg %p1705_p6 }
 0x5d9   : > { %p1712_p2 = por %p1711_p11, %p1710_p8 }
 0x5db   : > { %p1713_p3 = pnand %p1712_p2, %p1706_p10 }
 0x5dd   : > { %1716 = shalt.err (!%p1713_p3)
}
 0x5de   : > { %s1772_s16 = smov 128  }
 0x5df   : > { %1526 = dma.vmem_to_hbm [thread:$0]  (%p2205_p0), %s2141_s15, 256, %s2139_s10, %s1132_s22, %s1772_s16, %s1772_s16, %s1770_s12  }
 0x5e0 PF: > { %s1160_s26 = sand.u32 1, %s1747_s18   ;;  %p2206_p7 = scmp.ne.s32.totalorder %s2196_s25, 0 }
 0x5e1   : > { %p2207_p9 = scmp.ge.s32.totalorder %s1759_s21, 2  ;;  %s1161_s6 = scalar_lea.sflag [#allocation6], %s1160_s26 }
 0x5e3   : > { %p1540_p12 = pnand %p2207_p9, %p2206_p7 }
 0x5e5   : > { %1742 = dma.done.wait (!%p1540_p12), %s1161_s6, 256  }
 0x5e6   : > { %1744 = vsyncadd (!%p1540_p12), %s1161_s6, 4294967040  ;;  %p19_p1 = scmp.ge.s32.totalorder %s1919_s29, 4   ;;  %s2208_s18 = smov %s1751_s19 }
 0x5e7   : > { %s2209_s19 = smov %s1755_s20  ;;  %s2210_s20 = smov %s1935_s27 }
 0x5e8   : > { %s2211_s21 = smov %s1919_s29  ;;  %21 = sbr.rel (!%p19_p1) target bundleno = 6 (0x6), region = 98 }
 0x5ef   :  { %1166 = vsyncpa [#allocation5], 1 }
 0x5f0   :  { %1168 = vsyncpa [#allocation5 + $0x1], 1 }
 0x5f1   :  { %1169 = vsyncpa [#allocation8], 1 }
 0x5f2   :  { %1170 = vsyncpa [#allocation6], 1 }
 0x5f3   :  { %1172 = vsyncpa [#allocation6 + $0x1], 1 }

</bundles_post_ra>
